<compile_context>
chip_gen: v7x
topology: tpu7x:2x2x1
jax: 0.10.0
libtpu: 0.0.40
codegen_flags: <defaults>
</compile_context>

<pallas_src>
import numpy as np
import jax
import jax.numpy as jnp
from jax.experimental import pallas as pl
from jax.experimental.pallas import tpu as pltpu


H_IN, W_IN, C_IN = 7, 6, 2        # input_shape (PyTorch reshape: (B, 2, 7, 6))
C1, C2 = 32, 64                   # conv channels
PH, PW = 3, 3                     # pooled spatial (floor(7/2), floor(6/2))
N_IN = C_IN * H_IN * W_IN         # 84   flat input width (PyTorch NCHW flatten)
K_IN = 128                        # lane-padded input width (col 84 == 1.0)
ONES_COL = N_IN                   # 84   "ones" column carrying conv1 bias
N1 = PH * PW * C1                 # 288  real conv1/pool width per corner
BLK1 = 384                        # per-corner conv1 block padded to 3*128 lanes
N2 = C2 * PH * PW                 # 576  conv2 width (PyTorch NCHW flatten order)
NH = 128                          # fc1 hidden
NOUT = 7                          # logits
NOUT_PAD = 128                    # lane-dense padded output width


# ----------------------------------------------------------------------------
# Fused forward kernel
# ----------------------------------------------------------------------------
def convnet_kernel(x_ref, w1_ref, w2_ref, wh_ref, b_ref, o_ref):
    # conv1 (+bias via the ones column) for all four 2x2 pool corners in ONE
    # bf16 MXU matmul; accumulation in f32.
    xb = x_ref[...].astype(jnp.bfloat16)                               # (tm, 128)
    h1 = jnp.dot(xb, w1_ref[...], preferred_element_type=jnp.float32)  # (tm, 1536)

    # 2x2 maxpool == max over the four 384-wide, 128-aligned corner slices,
    # then one ReLU (max/ReLU commute).  Column 288 is a constant 1.0 that
    # carries conv2's bias through the next matmul.
    m = jnp.maximum(jnp.maximum(h1[:, :BLK1], h1[:, BLK1:2 * BLK1]),
                    jnp.maximum(h1[:, 2 * BLK1:3 * BLK1], h1[:, 3 * BLK1:]))
    pooled = jnp.maximum(m, 0.0)                                       # (tm, 384)

    # conv2 (+bias via pooled[:,288] == 1) + ReLU
    feat = jnp.dot(pooled.astype(jnp.bfloat16), w2_ref[...],
                   preferred_element_type=jnp.float32)                 # (tm, 576)
    feat = jnp.maximum(feat, 0.0)

    # fc1 + ReLU and output layer (fc1/output weights stacked in one buffer,
    # their biases stacked in another; bias adds stay f32).
    wh = wh_ref[...]                                                   # (704, 128) bf16
    bias = b_ref[...]                                                  # (2, 128)   f32
    h = jnp.dot(feat.astype(jnp.bfloat16), wh[:N2, :],
                preferred_element_type=jnp.float32) + bias[0:1, :]
    h = jnp.maximum(h, 0.0)                                            # (tm, 128)
    o_ref[...] = (jnp.dot(h.astype(jnp.bfloat16), wh[N2:, :],
                          preferred_element_type=jnp.float32) + bias[1:2, :])


# ----------------------------------------------------------------------------
# Parameters (PyTorch layout) and one-time weight re-layout (hoisted)
# ----------------------------------------------------------------------------
def init_params(key):
    ks = jax.random.split(key, 8)
    s = 0.1
    return {
        "w_conv1": s * jax.random.normal(ks[0], (C1, C_IN, 3, 3), jnp.float32),
        "b_conv1": s * jax.random.normal(ks[1], (C1,), jnp.float32),
        "w_conv2": s * jax.random.normal(ks[2], (C2, C1, 3, 3), jnp.float32),
        "b_conv2": s * jax.random.normal(ks[3], (C2,), jnp.float32),
        "w_fc1":   s * jax.random.normal(ks[4], (NH, N2), jnp.float32),
        "b_fc1":   s * jax.random.normal(ks[5], (NH,), jnp.float32),
        "w_out":   s * jax.random.normal(ks[6], (NOUT, NH), jnp.float32),
        "b_out":   s * jax.random.normal(ks[7], (NOUT,), jnp.float32),
    }


def prepare_weights(params):
    """One-time fold of the PyTorch-style parameters into the dense bf16 matmul
    operands the fused kernel consumes (no per-forward re-layout ops)."""
    w_conv1 = np.asarray(params["w_conv1"], np.float32)   # (32, 2, 3, 3)  OIHW
    b_conv1 = np.asarray(params["b_conv1"], np.float32)
    w_conv2 = np.asarray(params["w_conv2"], np.float32)   # (64, 32, 3, 3) OIHW
    b_conv2 = np.asarray(params["b_conv2"], np.float32)
    w_fc1   = np.asarray(params["w_fc1"],   np.float32)   # (128, 576)
    b_fc1   = np.asarray(params["b_fc1"],   np.float32)
    w_out   = np.asarray(params["w_out"],   np.float32)   # (7, 128)
    b_out   = np.asarray(params["b_out"],   np.float32)

    # conv1 -> one dense (128 -> 1536) map, four 384-wide blocks (one per 2x2
    # pool corner).  Input row = ic*42 + ih*6 + iw (NCHW flatten); row 84 is
    # the ones column (carries conv1 bias); rows 85..127 are zero padding.
    # Output col = corner*384 + ph*96 + pw*32 + oc; col corner*384 + 288 is a
    # "ones generator" so pooled[:, 288] == 1.0 (carries conv2's bias next).
    w1 = np.zeros((K_IN, 4 * BLK1), np.float32)
    for k in range(4):
        dh, dw = divmod(k, 2)
        base = k * BLK1
        for ph in range(PH):
            for pw in range(PW):
                h, w = 2 * ph + dh, 2 * pw + dw
                col0 = base + ph * (PW * C1) + pw * C1
                for kh in range(3):
                    ih = h + kh - 1
                    if not 0 <= ih < H_IN:
                        continue
                    for kw in range(3):
                        iw = w + kw - 1
                        if not 0 <= iw < W_IN:
                            continue
                        for ic in range(C_IN):
                            row = ic * (H_IN * W_IN) + ih * W_IN + iw
                            w1[row, col0:col0 + C1] += w_conv1[:, ic, kh, kw]
        w1[ONES_COL, base:base + N1] = np.tile(b_conv1, PH * PW)
        w1[ONES_COL, base + N1] = 1.0

    # conv2 -> dense (384 -> 576).  Rows 0..287: pooled (ph, pw, c) order;
    # row 288: conv2 bias (multiplied by the constant-1 pooled column);
    # rows 289..383: zero pad.  Output col = oc*9 + oh*3 + ow (NCHW flatten).
    w2 = np.zeros((BLK1, N2), np.float32)
    for oh in range(PH):
        for ow in range(PW):
            for kh in range(3):
                ih = oh + kh - 1
                if not 0 <= ih < PH:
                    continue
                for kw in range(3):
                    iw = ow + kw - 1
                    if not 0 <= iw < PW:
                        continue
                    rows = ih * (PW * C1) + iw * C1 + np.arange(C1)
                    cols = np.arange(C2) * (PH * PW) + oh * PW + ow
                    w2[np.ix_(rows, cols)] += w_conv2[:, :, kh, kw].T
    w2[N1, :] = np.repeat(b_conv2, PH * PW)

    # fc1 + output weights stacked into one (704, 128) buffer (output padded to
    # 128 lanes for a lane-dense store); fc1/output biases in one (2, 128) f32.
    wh = np.zeros((N2 + NH, NOUT_PAD), np.float32)
    wh[:N2, :NH] = w_fc1.T
    wh[N2:, :NOUT] = w_out.T
    bias = np.zeros((2, NOUT_PAD), np.float32)
    bias[0, :NH] = b_fc1
    bias[1, :NOUT] = b_out

    return {"w1": jnp.asarray(w1, jnp.bfloat16),
            "w2": jnp.asarray(w2, jnp.bfloat16),
            "wh": jnp.asarray(wh, jnp.bfloat16),
            "bias": jnp.asarray(bias, jnp.float32)}


# ----------------------------------------------------------------------------
# Forward wrapper
# ----------------------------------------------------------------------------
def convnet_forward(weights, x, *, batch_tile=512):
    """x: (B, 84) flat states (PyTorch forward reshapes to (B, 2, 7, 6))."""
    B = x.shape[0]
    # Lane-dense 128-wide input: cols 0..83 = state, col 84 = 1.0 (bias), rest 0.
    xp = jnp.pad(x.astype(jnp.float32), ((0, 0), (0, K_IN - N_IN)))
    xp = xp.at[:, ONES_COL].set(1.0)
    wargs = (weights["w1"], weights["w2"], weights["wh"], weights["bias"])
    vmem = pltpu.MemorySpace.VMEM

    if B > batch_tile:
        # Pipelined row-grid path for large DQN batches.  Pad B up so it never
        # falls back to an un-pipelined whole-batch call, and force an even
        # step count so v7x's two TensorCores get equal work.
        steps = -(-B // batch_tile)
        if steps % 2:
            steps += 1
        tile = ((-(-B // steps)) + 7) // 8 * 8
        Bp = steps * tile
        if Bp > B:
            xp = jnp.pad(xp, ((0, Bp - B), (0, 0)))
        w_specs = [pl.BlockSpec(w.shape, (lambda i, nd=w.ndim: (0,) * nd))
                   for w in wargs]
        out = pl.pallas_call(
            convnet_kernel,
            out_shape=jax.ShapeDtypeStruct((Bp, NOUT_PAD), jnp.float32),
            grid=(steps,),
            in_specs=[pl.BlockSpec((tile, K_IN), lambda i: (i, 0))] + w_specs,
            out_specs=pl.BlockSpec((tile, NOUT_PAD), lambda i: (i, 0)),
            compiler_params=pltpu.CompilerParams(
                dimension_semantics=("parallel",)),
        )(xp, *wargs)
        return out[:B, :NOUT]

    # Small-batch path: whole problem (<1 MiB of bf16 weights) resident in VMEM,
    # 5 operands -> 5 DMA descriptors.
    out = pl.pallas_call(
        convnet_kernel,
        out_shape=jax.ShapeDtypeStruct((B, NOUT_PAD), jnp.float32),
        in_specs=[pl.BlockSpec(memory_space=vmem)] * 5,
        out_specs=pl.BlockSpec(memory_space=vmem),
    )(xp, *wargs)
    return out[:, :NOUT]


# ----------------------------------------------------------------------------
# Pure-JAX reference (PyTorch semantics, NCHW) for correctness check
# ----------------------------------------------------------------------------
def convnet_forward_ref(params, x):
    B = x.shape[0]
    x_nchw = x.reshape(B, 2, 7, 6)
    dn1 = jax.lax.conv_dimension_numbers(x_nchw.shape, params["w_conv1"].shape,
                                         ("NCHW", "OIHW", "NCHW"))
    y1 = jax.lax.conv_general_dilated(x_nchw, params["w_conv1"], (1, 1),
                                      ((1, 1), (1, 1)), dimension_numbers=dn1)
    y1 = jax.nn.relu(y1 + params["b_conv1"][None, :, None, None])
    pooled = jax.lax.reduce_window(y1, -jnp.inf, jax.lax.max,
                                   (1, 1, 2, 2), (1, 1, 2, 2), "VALID")
    dn2 = jax.lax.conv_dimension_numbers(pooled.shape, params["w_conv2"].shape,
                                         ("NCHW", "OIHW", "NCHW"))
    y2 = jax.lax.conv_general_dilated(pooled, params["w_conv2"], (1, 1),
                                      ((1, 1), (1, 1)), dimension_numbers=dn2)
    y2 = jax.nn.relu(y2 + params["b_conv2"][None, :, None, None])
    feat = y2.reshape(B, 576)
    h = jax.nn.relu(feat @ params["w_fc1"].T + params["b_fc1"])
    return h @ params["w_out"].T + params["b_out"]


if __name__ == "__main__":
    key = jax.random.PRNGKey(0)
    pkey, xkey, bkey = jax.random.split(key, 3)
    params = init_params(pkey)
    weights = prepare_weights(params)   # one-time weight re-layout (hoisted)

    # batch=2, flat state of 7*6*2 = 84 (the forward reshapes to (B, 2, 7, 6))
    x = jax.random.normal(xkey, (2, N_IN), jnp.float32)
    out = jax.block_until_ready(jax.jit(convnet_forward)(weights, x))
    assert out.shape == (2, NOUT)
    ref = convnet_forward_ref(params, x)
    np.testing.assert_allclose(np.asarray(out), np.asarray(ref),
                               atol=5e-2, rtol=5e-2)

    # Exercise the pipelined / megacore grid path (padding + even step count).
    xb = jax.random.normal(bkey, (300, N_IN), jnp.float32)
    fwd_big = jax.jit(lambda w, a: convnet_forward(w, a, batch_tile=128))
    out_b = jax.block_until_ready(fwd_big(weights, xb))
    assert out_b.shape == (300, NOUT)
    ref_b = convnet_forward_ref(params, xb)
    np.testing.assert_allclose(np.asarray(out_b), np.asarray(ref_b),
                               atol=5e-2, rtol=5e-2)

    print("KERNEL_OK")
</pallas_src>

<mosaic_0001>
module attributes {stable_mosaic.version = 11 : i64} {
  func.func @convnet_kernel(%arg0: memref<2x128xf32, #tpu.memory_space<vmem>>, %arg1: memref<128x1536xbf16, #tpu.memory_space<vmem>>, %arg2: memref<384x576xbf16, #tpu.memory_space<vmem>>, %arg3: memref<704x128xbf16, #tpu.memory_space<vmem>>, %arg4: memref<2x128xf32, #tpu.memory_space<vmem>>, %arg5: memref<2x128xf32, #tpu.memory_space<vmem>>) attributes {dimension_semantics = [], scalar_prefetch = 0 : i64, scratch_operands = 0 : i64, tpu.core_type = #tpu.core_type<tc>} {
    %c0 = arith.constant 0 : index
    %c0_0 = arith.constant 0 : index
    %0 = vector.load %arg0[%c0, %c0_0] : memref<2x128xf32, #tpu.memory_space<vmem>>, vector<2x128xf32>
    %1 = arith.truncf %0 : vector<2x128xf32> to vector<2x128xbf16>
    %c0_1 = arith.constant 0 : index
    %c0_2 = arith.constant 0 : index
    %2 = vector.load %arg1[%c0_1, %c0_2] : memref<128x1536xbf16, #tpu.memory_space<vmem>>, vector<128x1536xbf16>
    %cst = arith.constant dense<0.000000e+00> : vector<2x1536xf32>
    %3 = tpu.matmul %1, %2, %cst {dimension_numbers = #tpu.dot_dimension_numbers<[1], [0], [0], [1], [0, 0, 1, 1], [], []>} : vector<2x128xbf16>, vector<128x1536xbf16>, vector<2x1536xf32> -> vector<2x1536xf32>
    %4 = vector.extract_strided_slice %3 {offsets = [0, 0], sizes = [2, 384], strides = [1, 1]} : vector<2x1536xf32> to vector<2x384xf32>
    %5 = vector.extract_strided_slice %3 {offsets = [0, 384], sizes = [2, 384], strides = [1, 1]} : vector<2x1536xf32> to vector<2x384xf32>
    %6 = arith.maximumf %4, %5 : vector<2x384xf32>
    %7 = vector.extract_strided_slice %3 {offsets = [0, 768], sizes = [2, 384], strides = [1, 1]} : vector<2x1536xf32> to vector<2x384xf32>
    %8 = vector.extract_strided_slice %3 {offsets = [0, 1152], sizes = [2, 384], strides = [1, 1]} : vector<2x1536xf32> to vector<2x384xf32>
    %9 = arith.maximumf %7, %8 : vector<2x384xf32>
    %10 = arith.maximumf %6, %9 : vector<2x384xf32>
    %cst_3 = arith.constant 0.000000e+00 : f32
    %11 = vector.broadcast %cst_3 : f32 to vector<2x384xf32>
    %12 = arith.maximumf %10, %11 : vector<2x384xf32>
    %13 = arith.truncf %12 : vector<2x384xf32> to vector<2x384xbf16>
    %c0_4 = arith.constant 0 : index
    %c0_5 = arith.constant 0 : index
    %14 = vector.load %arg2[%c0_4, %c0_5] : memref<384x576xbf16, #tpu.memory_space<vmem>>, vector<384x576xbf16>
    %cst_6 = arith.constant dense<0.000000e+00> : vector<2x576xf32>
    %15 = tpu.matmul %13, %14, %cst_6 {dimension_numbers = #tpu.dot_dimension_numbers<[1], [0], [0], [1], [0, 0, 1, 1], [], []>} : vector<2x384xbf16>, vector<384x576xbf16>, vector<2x576xf32> -> vector<2x576xf32>
    %cst_7 = arith.constant 0.000000e+00 : f32
    %16 = vector.broadcast %cst_7 : f32 to vector<2x576xf32>
    %17 = arith.maximumf %15, %16 : vector<2x576xf32>
    %c0_8 = arith.constant 0 : index
    %c0_9 = arith.constant 0 : index
    %18 = vector.load %arg3[%c0_8, %c0_9] : memref<704x128xbf16, #tpu.memory_space<vmem>>, vector<704x128xbf16>
    %c0_10 = arith.constant 0 : index
    %c0_11 = arith.constant 0 : index
    %19 = vector.load %arg4[%c0_10, %c0_11] : memref<2x128xf32, #tpu.memory_space<vmem>>, vector<2x128xf32>
    %20 = arith.truncf %17 : vector<2x576xf32> to vector<2x576xbf16>
    %21 = vector.extract_strided_slice %18 {offsets = [0, 0], sizes = [576, 128], strides = [1, 1]} : vector<704x128xbf16> to vector<576x128xbf16>
    %cst_12 = arith.constant dense<0.000000e+00> : vector<2x128xf32>
    %22 = tpu.matmul %20, %21, %cst_12 {dimension_numbers = #tpu.dot_dimension_numbers<[1], [0], [0], [1], [0, 0, 1, 1], [], []>} : vector<2x576xbf16>, vector<576x128xbf16>, vector<2x128xf32> -> vector<2x128xf32>
    %23 = vector.extract_strided_slice %19 {offsets = [0, 0], sizes = [1, 128], strides = [1, 1]} : vector<2x128xf32> to vector<1x128xf32>
    %24 = vector.broadcast %23 : vector<1x128xf32> to vector<2x128xf32>
    %25 = arith.addf %22, %24 : vector<2x128xf32>
    %cst_13 = arith.constant 0.000000e+00 : f32
    %26 = vector.broadcast %cst_13 : f32 to vector<2x128xf32>
    %27 = arith.maximumf %25, %26 : vector<2x128xf32>
    %28 = arith.truncf %27 : vector<2x128xf32> to vector<2x128xbf16>
    %29 = vector.extract_strided_slice %18 {offsets = [576, 0], sizes = [128, 128], strides = [1, 1]} : vector<704x128xbf16> to vector<128x128xbf16>
    %cst_14 = arith.constant dense<0.000000e+00> : vector<2x128xf32>
    %30 = tpu.matmul %28, %29, %cst_14 {dimension_numbers = #tpu.dot_dimension_numbers<[1], [0], [0], [1], [0, 0, 1, 1], [], []>} : vector<2x128xbf16>, vector<128x128xbf16>, vector<2x128xf32> -> vector<2x128xf32>
    %31 = vector.extract_strided_slice %19 {offsets = [1, 0], sizes = [1, 128], strides = [1, 1]} : vector<2x128xf32> to vector<1x128xf32>
    %32 = vector.broadcast %31 : vector<1x128xf32> to vector<2x128xf32>
    %33 = arith.addf %30, %32 : vector<2x128xf32>
    %c0_15 = arith.constant 0 : index
    %c0_16 = arith.constant 0 : index
    %34 = vector.load %arg5[%c0_15, %c0_16] : memref<2x128xf32, #tpu.memory_space<vmem>>, vector<2x128xf32>
    tpu.vector_store %arg5[%c0_15, %c0_16], %33 {strides = array<i32>} : memref<2x128xf32, #tpu.memory_space<vmem>>, vector<2x128xf32>,
    return
  }
}

</mosaic_0001>

<bundles_post_ra>
// kernel: convnet_forward.1
= control target key start
LH: loop header
LB: loop body
LE: loop exit
PB: predicated region body
PF: predicated region fallthrough
CT: control target
= control target key end

     0   :  { %v3219_v2 = vmov 0   ;;  %s4111_s0 = inlined_call_operand.vmem [shape: f32[2,128], index: 0, kind: input, shape index: {}]   ;;  %s4112_s1 = inlined_call_operand.vmem [shape: bf16[128,1536], index: 1, kind: input, shape index: {}]   ;;  %s4113_s2 = inlined_call_operand.vmem [shape: bf16[384,576], index: 2, kind: input, shape index: {}]   ;;  %s4114_s3 = inlined_call_operand.vmem [shape: bf16[704,128], index: 3, kind: input, shape index: {}]   ;;  %s4115_s4 = inlined_call_operand.vmem [shape: f32[2,128], index: 4, kind: input, shape index: {}]   ;;  %s4116_s5 = inlined_call_operand.hbm [shape: f32[2,128], index: 5, kind: output, shape index: {}]  }
   0x1   :  { %v2839_v0 = vld [vmem:[%s4112_s1 + $0x4] ss:$48 sps:$4 sm:$0xff]   ;;  %v2841_v1 = vld [vmem:[%s4112_s1 + $0xc] ss:$48 sps:$4 sm:$0xff]   ;;  %632 = vmatprep.mubr.bf16.mxu0 %v3219_v2  ;;  %673 = vmatprep.mubr.bf16.mxu1 %v3219_v2  ;;  %v2843_v3 = vld [vmem:[%s4112_s1] ss:$48 sps:$4 sm:$0xff]  }
   0x2   :  { %600 = vmatprep.subr.bf16.mxu0 %v2839_v0  ;;  %v2844_v4 = vld [vmem:[%s4112_s1 + $0x8] ss:$48 sps:$4 sm:$0xff]   ;;  %641 = vmatprep.subr.bf16.mxu1 %v2841_v1  ;;  %v2845_v5 = vld [vmem:[%s4112_s1 + $0x64] ss:$48 sps:$4 sm:$0xff]   ;;  %v2847_v6 = vld [vmem:[%s4112_s1 + $0x6c] ss:$48 sps:$4 sm:$0xff]  }
   0x3   :  { %601 = vmatpush1.bf16.msra.mxu0 %v2843_v3  ;;  %642 = vmatpush1.bf16.msra.mxu1 %v2844_v4  ;;  %v2849_v7 = vld [vmem:[%s4112_s1 + $0x60] ss:$48 sps:$4 sm:$0xff]   ;;  %v2850_v8 = vld [vmem:[%s4112_s1 + $0x68] ss:$48 sps:$4 sm:$0xff]   ;;  %v2851_v9 = vld [vmem:[%s4112_s1 + $0xc4] ss:$48 sps:$4 sm:$0xff]  }
   0x4   :  { %602 = vmatprep.subr.bf16.mxu0 %v2845_v5  ;;  %643 = vmatprep.subr.bf16.mxu1 %v2847_v6  ;;  %v2853_v10 = vld [vmem:[%s4112_s1 + $0xcc] ss:$48 sps:$4 sm:$0xff]   ;;  %v2855_v11 = vld [vmem:[%s4112_s1 + $0xc0] ss:$48 sps:$4 sm:$0xff]   ;;  %v2856_v12 = vld [vmem:[%s4112_s1 + $0xc8] ss:$48 sps:$4 sm:$0xff]  }
   0x5   :  { %v2857_v13 = vld [vmem:[%s4112_s1 + $0x124] ss:$48 sps:$4 sm:$0xff]   ;;  %v2859_v14 = vld [vmem:[%s4112_s1 + $0x12c] ss:$48 sps:$4 sm:$0xff]   ;;  %v2861_v15 = vld [vmem:[%s4112_s1 + $0x120] ss:$48 sps:$4 sm:$0xff]  }
   0x6   :  { %v2862_v16 = vld [vmem:[%s4112_s1 + $0x128] ss:$48 sps:$4 sm:$0xff]   ;;  %v2863_v17 = vld [vmem:[%s4112_s1 + $0x184] ss:$48 sps:$4 sm:$0xff]   ;;  %v2865_v18 = vld [vmem:[%s4112_s1 + $0x18c] ss:$48 sps:$4 sm:$0xff]  }
   0x7   :  { %603 = vmatpush1.bf16.msra.mxu0 %v2849_v7  ;;  %644 = vmatpush1.bf16.msra.mxu1 %v2850_v8  ;;  %v2867_v19 = vld [vmem:[%s4112_s1 + $0x180] ss:$48 sps:$4 sm:$0xff]   ;;  %v2868_v20 = vld [vmem:[%s4112_s1 + $0x188] ss:$48 sps:$4 sm:$0xff]   ;;  %v2869_v21 = vld [vmem:[%s4112_s1 + $0x1e4] ss:$48 sps:$4 sm:$0xff]  }
   0x8   :  { %604 = vmatprep.subr.bf16.mxu0 %v2851_v9  ;;  %645 = vmatprep.subr.bf16.mxu1 %v2853_v10  ;;  %v2871_v22 = vld [vmem:[%s4112_s1 + $0x1ec] ss:$48 sps:$4 sm:$0xff]   ;;  %v2873_v23 = vld [vmem:[%s4112_s1 + $0x1e0] ss:$48 sps:$4 sm:$0xff]   ;;  %v2874_v24 = vld [vmem:[%s4112_s1 + $0x1e8] ss:$48 sps:$4 sm:$0xff]  }
   0x9   :  { %v2875_v25 = vld [vmem:[%s4112_s1 + $0x244] ss:$48 sps:$4 sm:$0xff]   ;;  %v2877_v26 = vld [vmem:[%s4112_s1 + $0x24c] ss:$48 sps:$4 sm:$0xff]   ;;  %v2879_v27 = vld [vmem:[%s4112_s1 + $0x240] ss:$48 sps:$4 sm:$0xff]  }
   0xa   :  { %v2880_v28 = vld [vmem:[%s4112_s1 + $0x248] ss:$48 sps:$4 sm:$0xff]   ;;  %v2881_v29 = vld [vmem:[%s4112_s1 + $0x2a4] ss:$48 sps:$4 sm:$0xff]   ;;  %v2883_v30 = vld [vmem:[%s4112_s1 + $0x2ac] ss:$48 sps:$4 sm:$0xff]  }
   0xb   :  { %605 = vmatpush1.bf16.msra.mxu0 %v2855_v11  ;;  %646 = vmatpush1.bf16.msra.mxu1 %v2856_v12  ;;  %v2885_v31 = vld [vmem:[%s4112_s1 + $0x2a0] ss:$48 sps:$4 sm:$0xff]   ;;  %v2886_v32 = vld [vmem:[%s4112_s1 + $0x2a8] ss:$48 sps:$4 sm:$0xff]   ;;  %v2889_v34 = vld [vmem:[%s4112_s1 + $0x14] ss:$48 sps:$4 sm:$0xff]  }
   0xc   :  { %606 = vmatprep.subr.bf16.mxu0 %v2857_v13  ;;  %647 = vmatprep.subr.bf16.mxu1 %v2859_v14  ;;  %v22_v33 = vld [vmem:[%s4111_s0] sm:$0x3]  ;;  %v2892_v35 = vld [vmem:[%s4112_s1 + $0x1c] ss:$48 sps:$4 sm:$0xff]   ;;  %v2890_v38 = vld [vmem:[%s4112_s1 + $0x18] ss:$48 sps:$4 sm:$0xff]  }
   0xd   :  { %v3360_v36 = vpack.c.bf16 %v22_v33, %v22_v33  ;;  %v2887_v37 = vld [vmem:[%s4112_s1 + $0x10] ss:$48 sps:$4 sm:$0xff]   ;;  %v2895_v39 = vld [vmem:[%s4112_s1 + $0x74] ss:$48 sps:$4 sm:$0xff]   ;;  %v2898_v40 = vld [vmem:[%s4112_s1 + $0x7c] ss:$48 sps:$4 sm:$0xff]  }
   0xe   :  { %v2893_v41 = vld [vmem:[%s4112_s1 + $0x70] ss:$48 sps:$4 sm:$0xff]   ;;  %v2896_v42 = vld [vmem:[%s4112_s1 + $0x78] ss:$48 sps:$4 sm:$0xff]   ;;  %v2901_v43 = vld [vmem:[%s4112_s1 + $0xd4] ss:$48 sps:$4 sm:$0xff]  }
   0xf   :  { %607 = vmatpush1.bf16.msra.mxu0 %v2861_v15  ;;  %648 = vmatpush1.bf16.msra.mxu1 %v2862_v16  ;;  %v2904_v44 = vld [vmem:[%s4112_s1 + $0xdc] ss:$48 sps:$4 sm:$0xff]   ;;  %v2899_v45 = vld [vmem:[%s4112_s1 + $0xd0] ss:$48 sps:$4 sm:$0xff]   ;;  %v2902_v46 = vld [vmem:[%s4112_s1 + $0xd8] ss:$48 sps:$4 sm:$0xff]  }
  0x10   :  { %608 = vmatprep.subr.bf16.mxu0 %v2863_v17  ;;  %649 = vmatprep.subr.bf16.mxu1 %v2865_v18  ;;  %v2907_v47 = vld [vmem:[%s4112_s1 + $0x134] ss:$48 sps:$4 sm:$0xff]   ;;  %v2910_v48 = vld [vmem:[%s4112_s1 + $0x13c] ss:$48 sps:$4 sm:$0xff]   ;;  %v2905_v49 = vld [vmem:[%s4112_s1 + $0x130] ss:$48 sps:$4 sm:$0xff]  }
  0x11   :  { %v2908_v50 = vld [vmem:[%s4112_s1 + $0x138] ss:$48 sps:$4 sm:$0xff]   ;;  %v2913_v51 = vld [vmem:[%s4112_s1 + $0x194] ss:$48 sps:$4 sm:$0xff]   ;;  %v2916_v52 = vld [vmem:[%s4112_s1 + $0x19c] ss:$48 sps:$4 sm:$0xff]  }
  0x12   :  { %v2911_v53 = vld [vmem:[%s4112_s1 + $0x190] ss:$48 sps:$4 sm:$0xff]   ;;  %v2914_v54 = vld [vmem:[%s4112_s1 + $0x198] ss:$48 sps:$4 sm:$0xff]   ;;  %v2919_v55 = vld [vmem:[%s4112_s1 + $0x1f4] ss:$48 sps:$4 sm:$0xff]  }
  0x13   :  { %609 = vmatpush1.bf16.msra.mxu0 %v2867_v19  ;;  %650 = vmatpush1.bf16.msra.mxu1 %v2868_v20  ;;  %v2922_v56 = vld [vmem:[%s4112_s1 + $0x1fc] ss:$48 sps:$4 sm:$0xff]   ;;  %v2917_v57 = vld [vmem:[%s4112_s1 + $0x1f0] ss:$48 sps:$4 sm:$0xff]   ;;  %v2920_v58 = vld [vmem:[%s4112_s1 + $0x1f8] ss:$48 sps:$4 sm:$0xff]  }
  0x14   :  { %610 = vmatprep.subr.bf16.mxu0 %v2869_v21  ;;  %651 = vmatprep.subr.bf16.mxu1 %v2871_v22  ;;  %v2925_v59 = vld [vmem:[%s4112_s1 + $0x254] ss:$48 sps:$4 sm:$0xff]   ;;  %v2928_v60 = vld [vmem:[%s4112_s1 + $0x25c] ss:$48 sps:$4 sm:$0xff]   ;;  %v2923_v61 = vld [vmem:[%s4112_s1 + $0x250] ss:$48 sps:$4 sm:$0xff]  }
  0x15   :  { %v2926_v62 = vld [vmem:[%s4112_s1 + $0x258] ss:$48 sps:$4 sm:$0xff]   ;;  %v2931_v63 = vld [vmem:[%s4112_s1 + $0x2b4] ss:$48 sps:$4 sm:$0xff]   ;;  %v2934_v0 = vld [vmem:[%s4112_s1 + $0x2bc] ss:$48 sps:$4 sm:$0xff]  }
  0x16   :  { %v2929_v1 = vld [vmem:[%s4112_s1 + $0x2b0] ss:$48 sps:$4 sm:$0xff]   ;;  %v2932_v3 = vld [vmem:[%s4112_s1 + $0x2b8] ss:$48 sps:$4 sm:$0xff]   ;;  %v2937_v4 = vld [vmem:[%s4112_s1 + $0x24] ss:$48 sps:$4 sm:$0xff]  }
  0x17   :  { %611 = vmatpush1.bf16.msra.mxu0 %v2873_v23  ;;  %652 = vmatpush1.bf16.msra.mxu1 %v2874_v24  ;;  %v2940_v5 = vld [vmem:[%s4112_s1 + $0x2c] ss:$48 sps:$4 sm:$0xff]   ;;  %v2935_v6 = vld [vmem:[%s4112_s1 + $0x20] ss:$48 sps:$4 sm:$0xff]   ;;  %v2938_v7 = vld [vmem:[%s4112_s1 + $0x28] ss:$48 sps:$4 sm:$0xff]  }
  0x18   :  { %612 = vmatprep.subr.bf16.mxu0 %v2875_v25  ;;  %653 = vmatprep.subr.bf16.mxu1 %v2877_v26  ;;  %v2943_v8 = vld [vmem:[%s4112_s1 + $0x84] ss:$48 sps:$4 sm:$0xff]   ;;  %v2946_v9 = vld [vmem:[%s4112_s1 + $0x8c] ss:$48 sps:$4 sm:$0xff]   ;;  %v2941_v10 = vld [vmem:[%s4112_s1 + $0x80] ss:$48 sps:$4 sm:$0xff]  }
  0x19   :  { %v2944_v11 = vld [vmem:[%s4112_s1 + $0x88] ss:$48 sps:$4 sm:$0xff]   ;;  %v2949_v12 = vld [vmem:[%s4112_s1 + $0xe4] ss:$48 sps:$4 sm:$0xff]   ;;  %v2952_v13 = vld [vmem:[%s4112_s1 + $0xec] ss:$48 sps:$4 sm:$0xff]  }
  0x1a   :  { %v2947_v14 = vld [vmem:[%s4112_s1 + $0xe0] ss:$48 sps:$4 sm:$0xff]   ;;  %v2950_v15 = vld [vmem:[%s4112_s1 + $0xe8] ss:$48 sps:$4 sm:$0xff]   ;;  %v2955_v16 = vld [vmem:[%s4112_s1 + $0x144] ss:$48 sps:$4 sm:$0xff]  }
  0x1b   :  { %613 = vmatpush1.bf16.msra.mxu0 %v2879_v27  ;;  %654 = vmatpush1.bf16.msra.mxu1 %v2880_v28  ;;  %v2958_v17 = vld [vmem:[%s4112_s1 + $0x14c] ss:$48 sps:$4 sm:$0xff]   ;;  %v2953_v18 = vld [vmem:[%s4112_s1 + $0x140] ss:$48 sps:$4 sm:$0xff]   ;;  %v2956_v19 = vld [vmem:[%s4112_s1 + $0x148] ss:$48 sps:$4 sm:$0xff]  }
  0x1c   :  { %614 = vmatprep.subr.bf16.mxu0 %v2881_v29  ;;  %655 = vmatprep.subr.bf16.mxu1 %v2883_v30  ;;  %v2961_v20 = vld [vmem:[%s4112_s1 + $0x1a4] ss:$48 sps:$4 sm:$0xff]   ;;  %v2964_v21 = vld [vmem:[%s4112_s1 + $0x1ac] ss:$48 sps:$4 sm:$0xff]   ;;  %v2959_v22 = vld [vmem:[%s4112_s1 + $0x1a0] ss:$48 sps:$4 sm:$0xff]  }
  0x1d   :  { %v2962_v23 = vld [vmem:[%s4112_s1 + $0x1a8] ss:$48 sps:$4 sm:$0xff]   ;;  %v2967_v24 = vld [vmem:[%s4112_s1 + $0x204] ss:$48 sps:$4 sm:$0xff]   ;;  %v2970_v25 = vld [vmem:[%s4112_s1 + $0x20c] ss:$48 sps:$4 sm:$0xff]  }
  0x1e   :  { %v2965_v26 = vld [vmem:[%s4112_s1 + $0x200] ss:$48 sps:$4 sm:$0xff]   ;;  %v2968_v27 = vld [vmem:[%s4112_s1 + $0x208] ss:$48 sps:$4 sm:$0xff]   ;;  %v2973_v28 = vld [vmem:[%s4112_s1 + $0x264] ss:$48 sps:$4 sm:$0xff]  }
  0x1f   :  { %615 = vmatpush1.bf16.msra.mxu0 %v2885_v31  ;;  %656 = vmatpush1.bf16.msra.mxu1 %v2886_v32  ;;  %v2976_v29 = vld [vmem:[%s4112_s1 + $0x26c] ss:$48 sps:$4 sm:$0xff]   ;;  %v2971_v30 = vld [vmem:[%s4112_s1 + $0x260] ss:$48 sps:$4 sm:$0xff]   ;;  %v2974_v31 = vld [vmem:[%s4112_s1 + $0x268] ss:$48 sps:$4 sm:$0xff]  }
  0x20   :  { %682 = vmatprep.subr.bf16.mxu0 %v2889_v34  ;;  %723 = vmatprep.subr.bf16.mxu1 %v2892_v35  ;;  %v2979_v32 = vld [vmem:[%s4112_s1 + $0x2c4] ss:$48 sps:$4 sm:$0xff]   ;;  %v2982_v33 = vld [vmem:[%s4112_s1 + $0x2cc] ss:$48 sps:$4 sm:$0xff]   ;;  %v2977_v34 = vld [vmem:[%s4112_s1 + $0x2c0] ss:$48 sps:$4 sm:$0xff]  }
  0x21   :  { %v2980_v35 = vld [vmem:[%s4112_s1 + $0x2c8] ss:$48 sps:$4 sm:$0xff]  }
  0x22   :  { %633 = vmatmul.mubr.bf16.vlgmr.msra.gmra.mrb[0].mxu0 %v3360_v36  ;;  %674 = vmatmul.mubr.bf16.vlgmr.msra.gmra.mrb[0].mxu1 %v3360_v36 }
  0x23   :  { %683 = vmatpush1.bf16.msra.mxu0 %v2887_v37  ;;  %724 = vmatpush1.bf16.msra.mxu1 %v2890_v38  ;;  %v2983_v37 = vld [vmem:[%s4113_s2] ss:$20 sps:$4 sm:$0xff]   ;;  %v2985_v38 = vld [vmem:[%s4113_s2 + $0x4] ss:$20 sps:$4 sm:$0xff]  }
  0x24   :  { %684 = vmatprep.subr.bf16.mxu0 %v2895_v39  ;;  %725 = vmatprep.subr.bf16.mxu1 %v2898_v40  ;;  %v2986_v39 = vld [vmem:[%s4113_s2 + $0x8] ss:$20 sps:$4 sm:$0xff]   ;;  %v2988_v40 = vld [vmem:[%s4113_s2 + $0xc] ss:$20 sps:$4 sm:$0xff]  }
  0x25   :  { %714 = vmatprep.mubr.bf16.mxu0 %v3219_v2  ;;  %755 = vmatprep.mubr.bf16.mxu1 %v3219_v2 }
  0x27   :  { %685 = vmatpush1.bf16.msra.mxu0 %v2893_v41  ;;  %726 = vmatpush1.bf16.msra.mxu1 %v2896_v42  ;;  %v2994_v41 = vld [vmem:[%s4113_s2 + $0x34] ss:$20 sps:$4 sm:$0xff]  }
  0x28   :  { %686 = vmatprep.subr.bf16.mxu0 %v2901_v43  ;;  %727 = vmatprep.subr.bf16.mxu1 %v2904_v44  ;;  %v2989_v42 = vld [vmem:[%s4113_s2 + $0x28] ss:$20 sps:$4 sm:$0xff]   ;;  %v2992_v43 = vld [vmem:[%s4113_s2 + $0x30] ss:$20 sps:$4 sm:$0xff]  }
  0x29   :  { %v2997_v44 = vld [vmem:[%s4113_s2 + $0x54] ss:$20 sps:$4 sm:$0xff]  }
  0x2b   :  { %687 = vmatpush1.bf16.msra.mxu0 %v2899_v45  ;;  %728 = vmatpush1.bf16.msra.mxu1 %v2902_v46  ;;  %v3000_v45 = vld [vmem:[%s4113_s2 + $0x5c] ss:$20 sps:$4 sm:$0xff]  }
  0x2c   :  { %688 = vmatprep.subr.bf16.mxu0 %v2907_v47  ;;  %729 = vmatprep.subr.bf16.mxu1 %v2910_v48  ;;  %v2995_v46 = vld [vmem:[%s4113_s2 + $0x50] ss:$20 sps:$4 sm:$0xff]   ;;  %v2998_v47 = vld [vmem:[%s4113_s2 + $0x58] ss:$20 sps:$4 sm:$0xff]  }
  0x2d   :  { %v3003_v48 = vld [vmem:[%s4113_s2 + $0x7c] ss:$20 sps:$4 sm:$0xff]  }
  0x2f   :  { %689 = vmatpush1.bf16.msra.mxu0 %v2905_v49  ;;  %730 = vmatpush1.bf16.msra.mxu1 %v2908_v50  ;;  %v3006_v49 = vld [vmem:[%s4113_s2 + $0x84] ss:$20 sps:$4 sm:$0xff]  }
  0x30   :  { %690 = vmatprep.subr.bf16.mxu0 %v2913_v51  ;;  %731 = vmatprep.subr.bf16.mxu1 %v2916_v52  ;;  %v3001_v50 = vld [vmem:[%s4113_s2 + $0x78] ss:$20 sps:$4 sm:$0xff]   ;;  %v3004_v51 = vld [vmem:[%s4113_s2 + $0x80] ss:$20 sps:$4 sm:$0xff]  }
  0x31   :  { %v3009_v52 = vld [vmem:[%s4113_s2 + $0xa4] ss:$20 sps:$4 sm:$0xff]  }
  0x33   :  { %691 = vmatpush1.bf16.msra.mxu0 %v2911_v53  ;;  %732 = vmatpush1.bf16.msra.mxu1 %v2914_v54  ;;  %v3012_v53 = vld [vmem:[%s4113_s2 + $0xac] ss:$20 sps:$4 sm:$0xff]  }
  0x34   :  { %692 = vmatprep.subr.bf16.mxu0 %v2919_v55  ;;  %733 = vmatprep.subr.bf16.mxu1 %v2922_v56  ;;  %v3007_v54 = vld [vmem:[%s4113_s2 + $0xa0] ss:$20 sps:$4 sm:$0xff]   ;;  %v3010_v55 = vld [vmem:[%s4113_s2 + $0xa8] ss:$20 sps:$4 sm:$0xff]  }
  0x35   :  { %v3015_v56 = vld [vmem:[%s4113_s2 + $0xcc] ss:$20 sps:$4 sm:$0xff]  }
  0x37   :  { %693 = vmatpush1.bf16.msra.mxu0 %v2917_v57  ;;  %734 = vmatpush1.bf16.msra.mxu1 %v2920_v58  ;;  %v3018_v57 = vld [vmem:[%s4113_s2 + $0xd4] ss:$20 sps:$4 sm:$0xff]  }
  0x38   :  { %694 = vmatprep.subr.bf16.mxu0 %v2925_v59  ;;  %735 = vmatprep.subr.bf16.mxu1 %v2928_v60  ;;  %v3013_v58 = vld [vmem:[%s4113_s2 + $0xc8] ss:$20 sps:$4 sm:$0xff]   ;;  %v3016_v59 = vld [vmem:[%s4113_s2 + $0xd0] ss:$20 sps:$4 sm:$0xff]  }
  0x39   :  { %v3021_v60 = vld [vmem:[%s4113_s2 + $0xf4] ss:$20 sps:$4 sm:$0xff]  }
  0x3b   :  { %695 = vmatpush1.bf16.msra.mxu0 %v2923_v61  ;;  %736 = vmatpush1.bf16.msra.mxu1 %v2926_v62  ;;  %v3024_v61 = vld [vmem:[%s4113_s2 + $0xfc] ss:$20 sps:$4 sm:$0xff]  }
  0x3c   :  { %696 = vmatprep.subr.bf16.mxu0 %v2931_v63  ;;  %737 = vmatprep.subr.bf16.mxu1 %v2934_v0  ;;  %v3019_v62 = vld [vmem:[%s4113_s2 + $0xf0] ss:$20 sps:$4 sm:$0xff]   ;;  %v3022_v63 = vld [vmem:[%s4113_s2 + $0xf8] ss:$20 sps:$4 sm:$0xff]  }
  0x3f   :  { %697 = vmatpush1.bf16.msra.mxu0 %v2929_v1  ;;  %738 = vmatpush1.bf16.msra.mxu1 %v2932_v3 }
  0x40   :  { %764 = vmatprep.subr.bf16.mxu0 %v2937_v4  ;;  %805 = vmatprep.subr.bf16.mxu1 %v2940_v5 }
  0x42   :  { %715 = vmatmul.mubr.bf16.vlgmr.msra.gmra.mrb[4].mxu0 %v3360_v36  ;;  %756 = vmatmul.mubr.bf16.vlgmr.msra.gmra.mrb[4].mxu1 %v3360_v36 }
  0x43   :  { %765 = vmatpush1.bf16.msra.mxu0 %v2935_v6  ;;  %806 = vmatpush1.bf16.msra.mxu1 %v2938_v7 }
  0x44   :  { %766 = vmatprep.subr.bf16.mxu0 %v2943_v8  ;;  %807 = vmatprep.subr.bf16.mxu1 %v2946_v9 }
  0x45   :  { %796 = vmatprep.mubr.bf16.mxu0 %v3219_v2  ;;  %837 = vmatprep.mubr.bf16.mxu1 %v3219_v2 }
  0x47   :  { %767 = vmatpush1.bf16.msra.mxu0 %v2941_v10  ;;  %808 = vmatpush1.bf16.msra.mxu1 %v2944_v11 }
  0x48   :  { %768 = vmatprep.subr.bf16.mxu0 %v2949_v12  ;;  %809 = vmatprep.subr.bf16.mxu1 %v2952_v13 }
  0x4b   :  { %769 = vmatpush1.bf16.msra.mxu0 %v2947_v14  ;;  %810 = vmatpush1.bf16.msra.mxu1 %v2950_v15 }
  0x4c   :  { %770 = vmatprep.subr.bf16.mxu0 %v2955_v16  ;;  %811 = vmatprep.subr.bf16.mxu1 %v2958_v17 }
  0x4f   :  { %771 = vmatpush1.bf16.msra.mxu0 %v2953_v18  ;;  %812 = vmatpush1.bf16.msra.mxu1 %v2956_v19 }
  0x50   :  { %772 = vmatprep.subr.bf16.mxu0 %v2961_v20  ;;  %813 = vmatprep.subr.bf16.mxu1 %v2964_v21 }
  0x53   :  { %773 = vmatpush1.bf16.msra.mxu0 %v2959_v22  ;;  %814 = vmatpush1.bf16.msra.mxu1 %v2962_v23 }
  0x54   :  { %774 = vmatprep.subr.bf16.mxu0 %v2967_v24  ;;  %815 = vmatprep.subr.bf16.mxu1 %v2970_v25 }
  0x57   :  { %775 = vmatpush1.bf16.msra.mxu0 %v2965_v26  ;;  %816 = vmatpush1.bf16.msra.mxu1 %v2968_v27 }
  0x58   :  { %776 = vmatprep.subr.bf16.mxu0 %v2973_v28  ;;  %817 = vmatprep.subr.bf16.mxu1 %v2976_v29 }
  0x5b   :  { %777 = vmatpush1.bf16.msra.mxu0 %v2971_v30  ;;  %818 = vmatpush1.bf16.msra.mxu1 %v2974_v31 }
  0x5c   :  { %778 = vmatprep.subr.bf16.mxu0 %v2979_v32  ;;  %819 = vmatprep.subr.bf16.mxu1 %v2982_v33 }
  0x5f   :  { %779 = vmatpush1.bf16.msra.mxu0 %v2977_v34  ;;  %820 = vmatpush1.bf16.msra.mxu1 %v2980_v35 }
  0x60   :  { %1629 = vmatprep.subr.bf16.mxu0 %v2985_v38  ;;  %1711 = vmatprep.subr.bf16.mxu1 %v2988_v40 }
  0x62   :  { %797 = vmatmul.mubr.bf16.vlgmr.msra.gmra.mrb[8].mxu0 %v3360_v36  ;;  %838 = vmatmul.mubr.bf16.vlgmr.msra.gmra.mrb[8].mxu1 %v3360_v36  ;;  %v2991_v36 = vld [vmem:[%s4113_s2 + $0x2c] ss:$20 sps:$4 sm:$0xff]  }
  0x63   :  { %1630 = vmatpush1.bf16.msra.mxu0 %v2983_v37  ;;  %1712 = vmatpush1.bf16.msra.mxu1 %v2986_v39 }
  0x64   :  { %1631 = vmatprep.subr.bf16.mxu0 %v2991_v36  ;;  %1713 = vmatprep.subr.bf16.mxu1 %v2994_v41 }
  0x67   :  { %1632 = vmatpush1.bf16.msra.mxu0 %v2989_v42  ;;  %1714 = vmatpush1.bf16.msra.mxu1 %v2992_v43 }
  0x68   :  { %1633 = vmatprep.subr.bf16.mxu0 %v2997_v44  ;;  %1715 = vmatprep.subr.bf16.mxu1 %v3000_v45 }
  0x6b   :  { %1634 = vmatpush1.bf16.msra.mxu0 %v2995_v46  ;;  %1716 = vmatpush1.bf16.msra.mxu1 %v2998_v47 }
  0x6c   :  { %1635 = vmatprep.subr.bf16.mxu0 %v3003_v48  ;;  %1717 = vmatprep.subr.bf16.mxu1 %v3006_v49 }
  0x6f   :  { %1636 = vmatpush1.bf16.msra.mxu0 %v3001_v50  ;;  %1718 = vmatpush1.bf16.msra.mxu1 %v3004_v51 }
  0x70   :  { %1637 = vmatprep.subr.bf16.mxu0 %v3009_v52  ;;  %1719 = vmatprep.subr.bf16.mxu1 %v3012_v53 }
  0x73   :  { %1638 = vmatpush1.bf16.msra.mxu0 %v3007_v54  ;;  %1720 = vmatpush1.bf16.msra.mxu1 %v3010_v55 }
  0x74   :  { %1639 = vmatprep.subr.bf16.mxu0 %v3015_v56  ;;  %1721 = vmatprep.subr.bf16.mxu1 %v3018_v57 }
  0x77   :  { %1640 = vmatpush1.bf16.msra.mxu0 %v3013_v58  ;;  %1722 = vmatpush1.bf16.msra.mxu1 %v3016_v59 }
  0x78   :  { %1641 = vmatprep.subr.bf16.mxu0 %v3021_v60  ;;  %1723 = vmatprep.subr.bf16.mxu1 %v3024_v61 }
  0x79   :  { %10 = vsyncpa [#allocation3], 0  ;;  %v3025_v0 = vld [vmem:[%s4113_s2 + $0x118] ss:$20 sps:$4 sm:$0xff]   ;;  %v3027_v1 = vld [vmem:[%s4113_s2 + $0x11c] ss:$20 sps:$4 sm:$0xff]  }
  0x7a   :  { %v3028_v3 = vld [vmem:[%s4113_s2 + $0x120] ss:$20 sps:$4 sm:$0xff]   ;;  %v3030_v4 = vld [vmem:[%s4113_s2 + $0x124] ss:$20 sps:$4 sm:$0xff]   ;;  %v3034_v8 = vld [vmem:[%s4113_s2 + $0x148] ss:$20 sps:$4 sm:$0xff]  }
  0x7b   :  { %1642 = vmatpush1.bf16.msra.mxu0 %v3019_v62  ;;  %1724 = vmatpush1.bf16.msra.mxu1 %v3022_v63  ;;  %v3033_v5 = vld [vmem:[%s4113_s2 + $0x144] ss:$20 sps:$4 sm:$0xff]   ;;  %v3036_v6 = vld [vmem:[%s4113_s2 + $0x14c] ss:$20 sps:$4 sm:$0xff]   ;;  %v3042_v10 = vld [vmem:[%s4113_s2 + $0x174] ss:$20 sps:$4 sm:$0xff]  }
  0x7c   :  { %1643 = vmatprep.subr.bf16.mxu0 %v3027_v1  ;;  %1725 = vmatprep.subr.bf16.mxu1 %v3030_v4  ;;  %v3031_v7 = vld [vmem:[%s4113_s2 + $0x140] ss:$20 sps:$4 sm:$0xff]   ;;  %v3037_v11 = vld [vmem:[%s4113_s2 + $0x168] ss:$20 sps:$4 sm:$0xff]   ;;  %v3040_v12 = vld [vmem:[%s4113_s2 + $0x170] ss:$20 sps:$4 sm:$0xff]  }
  0x7d   :  { %v3039_v9 = vld [vmem:[%s4113_s2 + $0x16c] ss:$20 sps:$4 sm:$0xff]   ;;  %v3045_v13 = vld [vmem:[%s4113_s2 + $0x194] ss:$20 sps:$4 sm:$0xff]   ;;  %v3048_v14 = vld [vmem:[%s4113_s2 + $0x19c] ss:$20 sps:$4 sm:$0xff]  }
  0x7e   :  { %v3043_v15 = vld [vmem:[%s4113_s2 + $0x190] ss:$20 sps:$4 sm:$0xff]   ;;  %v3046_v16 = vld [vmem:[%s4113_s2 + $0x198] ss:$20 sps:$4 sm:$0xff]   ;;  %v3052_v20 = vld [vmem:[%s4113_s2 + $0x1c0] ss:$20 sps:$4 sm:$0xff]  }
  0x7f   :  { %1644 = vmatpush1.bf16.msra.mxu0 %v3025_v0  ;;  %1726 = vmatpush1.bf16.msra.mxu1 %v3028_v3  ;;  %v3051_v17 = vld [vmem:[%s4113_s2 + $0x1bc] ss:$20 sps:$4 sm:$0xff]   ;;  %v3054_v18 = vld [vmem:[%s4113_s2 + $0x1c4] ss:$20 sps:$4 sm:$0xff]   ;;  %v3060_v22 = vld [vmem:[%s4113_s2 + $0x1ec] ss:$20 sps:$4 sm:$0xff]  }
  0x80   :  { %1645 = vmatprep.subr.bf16.mxu0 %v3033_v5  ;;  %1727 = vmatprep.subr.bf16.mxu1 %v3036_v6  ;;  %v3049_v19 = vld [vmem:[%s4113_s2 + $0x1b8] ss:$20 sps:$4 sm:$0xff]   ;;  %v3055_v23 = vld [vmem:[%s4113_s2 + $0x1e0] ss:$20 sps:$4 sm:$0xff]   ;;  %v3058_v24 = vld [vmem:[%s4113_s2 + $0x1e8] ss:$20 sps:$4 sm:$0xff]  }
  0x81   :  { %v3057_v21 = vld [vmem:[%s4113_s2 + $0x1e4] ss:$20 sps:$4 sm:$0xff]   ;;  %v3063_v25 = vld [vmem:[%s4113_s2 + $0x20c] ss:$20 sps:$4 sm:$0xff]   ;;  %v3066_v26 = vld [vmem:[%s4113_s2 + $0x214] ss:$20 sps:$4 sm:$0xff]  }
  0x82   :  { %v3061_v27 = vld [vmem:[%s4113_s2 + $0x208] ss:$20 sps:$4 sm:$0xff]   ;;  %v3064_v28 = vld [vmem:[%s4113_s2 + $0x210] ss:$20 sps:$4 sm:$0xff]   ;;  %v3070_v32 = vld [vmem:[%s4113_s2 + $0x238] ss:$20 sps:$4 sm:$0xff]  }
  0x83   :  { %1646 = vmatpush1.bf16.msra.mxu0 %v3031_v7  ;;  %1728 = vmatpush1.bf16.msra.mxu1 %v3034_v8  ;;  %v3069_v29 = vld [vmem:[%s4113_s2 + $0x234] ss:$20 sps:$4 sm:$0xff]   ;;  %v3072_v30 = vld [vmem:[%s4113_s2 + $0x23c] ss:$20 sps:$4 sm:$0xff]   ;;  %v3078_v34 = vld [vmem:[%s4113_s2 + $0x264] ss:$20 sps:$4 sm:$0xff]  }
  0x84   :  { %1647 = vmatprep.subr.bf16.mxu0 %v3039_v9  ;;  %1729 = vmatprep.subr.bf16.mxu1 %v3042_v10  ;;  %v3067_v31 = vld [vmem:[%s4113_s2 + $0x230] ss:$20 sps:$4 sm:$0xff]   ;;  %v3073_v35 = vld [vmem:[%s4113_s2 + $0x258] ss:$20 sps:$4 sm:$0xff]   ;;  %v3076_v37 = vld [vmem:[%s4113_s2 + $0x260] ss:$20 sps:$4 sm:$0xff]  }
  0x85   :  { %v3075_v33 = vld [vmem:[%s4113_s2 + $0x25c] ss:$20 sps:$4 sm:$0xff]   ;;  %v3081_v38 = vld [vmem:[%s4113_s2 + $0x284] ss:$20 sps:$4 sm:$0xff]   ;;  %v3084_v39 = vld [vmem:[%s4113_s2 + $0x28c] ss:$20 sps:$4 sm:$0xff]  }
  0x86   :  { %vm3221_vm0 = vmmov 0   ;;  %vm2192_vm1 = vcmask 523264  }
  0x87   :  { %1648 = vmatpush1.bf16.msra.mxu0 %v3037_v11  ;;  %1730 = vmatpush1.bf16.msra.mxu1 %v3040_v12  ;;  %v3079_v12 = vld [vmem:[%s4113_s2 + $0x280] ss:$20 sps:$4 sm:$0xff]  }
  0x88   :  { %1649 = vmatprep.subr.bf16.mxu0 %v3045_v13  ;;  %1731 = vmatprep.subr.bf16.mxu1 %v3048_v14  ;;  %v3082_v13 = vld [vmem:[%s4113_s2 + $0x288] ss:$20 sps:$4 sm:$0xff]  }
  0x8b   :  { %1650 = vmatpush1.bf16.msra.mxu0 %v3043_v15  ;;  %1732 = vmatpush1.bf16.msra.mxu1 %v3046_v16  ;;  %v3087_v15 = vld [vmem:[%s4113_s2 + $0x2ac] ss:$20 sps:$4 sm:$0xff]   ;;  %v3090_v16 = vld [vmem:[%s4113_s2 + $0x2b4] ss:$20 sps:$4 sm:$0xff]  }
  0x8c   :  { %1651 = vmatprep.subr.bf16.mxu0 %v3051_v17  ;;  %1733 = vmatprep.subr.bf16.mxu1 %v3054_v18  ;;  %v3085_v17 = vld [vmem:[%s4113_s2 + $0x2a8] ss:$20 sps:$4 sm:$0xff]   ;;  %v3088_v18 = vld [vmem:[%s4113_s2 + $0x2b0] ss:$20 sps:$4 sm:$0xff]  }
  0x8f   :  { %1652 = vmatpush1.bf16.msra.mxu0 %v3049_v19  ;;  %1734 = vmatpush1.bf16.msra.mxu1 %v3052_v20  ;;  %v3093_v19 = vld [vmem:[%s4113_s2 + $0x2d4] ss:$20 sps:$4 sm:$0xff]   ;;  %v3096_v20 = vld [vmem:[%s4113_s2 + $0x2dc] ss:$20 sps:$4 sm:$0xff]  }
  0x90   :  { %1653 = vmatprep.subr.bf16.mxu0 %v3057_v21  ;;  %1735 = vmatprep.subr.bf16.mxu1 %v3060_v22  ;;  %v3091_v21 = vld [vmem:[%s4113_s2 + $0x2d0] ss:$20 sps:$4 sm:$0xff]   ;;  %v3094_v22 = vld [vmem:[%s4113_s2 + $0x2d8] ss:$20 sps:$4 sm:$0xff]  }
  0x93   :  { %1654 = vmatpush1.bf16.msra.mxu0 %v3055_v23  ;;  %1736 = vmatpush1.bf16.msra.mxu1 %v3058_v24  ;;  %v3099_v23 = vld [vmem:[%s4113_s2 + $0x2fc] ss:$20 sps:$4 sm:$0xff]   ;;  %v3097_v24 = vld [vmem:[%s4113_s2 + $0x2f8] ss:$20 sps:$4 sm:$0xff]  }
  0x94   :  { %1655 = vmatprep.subr.bf16.mxu0 %v3063_v25  ;;  %1737 = vmatprep.subr.bf16.mxu1 %v3066_v26  ;;  %v3100_v25 = vld [vmem:[%s4113_s2 + $0x300] ss:$20 sps:$4 sm:$0xff]   ;;  %v3105_v26 = vld [vmem:[%s4113_s2 + $0x324] ss:$20 sps:$4 sm:$0xff]  }
  0x97   :  { %1656 = vmatpush1.bf16.msra.mxu0 %v3061_v27  ;;  %1738 = vmatpush1.bf16.msra.mxu1 %v3064_v28  ;;  %v3108_v27 = vld [vmem:[%s4113_s2 + $0x32c] ss:$20 sps:$4 sm:$0xff]  }
  0x98   :  { %1657 = vmatprep.subr.bf16.mxu0 %v3069_v29  ;;  %1739 = vmatprep.subr.bf16.mxu1 %v3072_v30  ;;  %v3103_v28 = vld [vmem:[%s4113_s2 + $0x320] ss:$20 sps:$4 sm:$0xff]   ;;  %v3106_v29 = vld [vmem:[%s4113_s2 + $0x328] ss:$20 sps:$4 sm:$0xff]  }
  0x99   :  { %v3111_v30 = vld [vmem:[%s4113_s2 + $0x34c] ss:$20 sps:$4 sm:$0xff]  }
  0x9b   :  { %1658 = vmatpush1.bf16.msra.mxu0 %v3067_v31  ;;  %1740 = vmatpush1.bf16.msra.mxu1 %v3070_v32  ;;  %v3114_v31 = vld [vmem:[%s4113_s2 + $0x354] ss:$20 sps:$4 sm:$0xff]  }
  0x9c   :  { %1659 = vmatprep.subr.bf16.mxu0 %v3075_v33  ;;  %1741 = vmatprep.subr.bf16.mxu1 %v3078_v34  ;;  %v3109_v32 = vld [vmem:[%s4113_s2 + $0x348] ss:$20 sps:$4 sm:$0xff]   ;;  %v3112_v33 = vld [vmem:[%s4113_s2 + $0x350] ss:$20 sps:$4 sm:$0xff]  }
  0x9d   :  { %v3117_v34 = vld [vmem:[%s4113_s2 + $0x374] ss:$20 sps:$4 sm:$0xff]  }
  0x9f   :  { %1660 = vmatpush1.bf16.msra.mxu0 %v3073_v35  ;;  %1742 = vmatpush1.bf16.msra.mxu1 %v3076_v37  ;;  %v3120_v35 = vld [vmem:[%s4113_s2 + $0x37c] ss:$20 sps:$4 sm:$0xff]  }
  0xa0   :  { %1670 = vmatprep.subr.bf16.mxu0 %v3081_v38  ;;  %1752 = vmatprep.subr.bf16.mxu1 %v3084_v39  ;;  %v3115_v37 = vld [vmem:[%s4113_s2 + $0x370] ss:$20 sps:$4 sm:$0xff]   ;;  %v3118_v38 = vld [vmem:[%s4113_s2 + $0x378] ss:$20 sps:$4 sm:$0xff]  }
  0xa1   :  { %v3123_v39 = vld [vmem:[%s4113_s2 + $0x39c] ss:$20 sps:$4 sm:$0xff]  }
  0xf5   :  { %v634_v40 = vpop.f32.mrb[0].mxu0  ;;  %v675_v36 = vpop.f32.mrb[0].mxu1 }
  0xf6   :  { %v636_v41 = vpop.f32.mrb[1].mxu0  ;;  %v677_v42 = vpop.f32.mrb[1].mxu1 }
  0xf7   :  { %v846_v43 = vmax.f32 %v634_v40, %v677_v42  ;;  %v638_v44 = vpop.f32.mrb[2].mxu0  ;;  %v679_v45 = vpop.f32.mrb[2].mxu1  ;;  %v3126_v40 = vld [vmem:[%s4113_s2 + $0x3a4] ss:$20 sps:$4 sm:$0xff]  }
  0xf8   :  { %v639_v46 = vpop.f32.mrb[3].mxu0  ;;  %v680_v47 = vpop.f32.mrb[3].mxu1  ;;  %v3128_v44 = vld [vmem:[%s4113_s2 + $0x10] ss:$20 sps:$4 sm:$0xff]  }
  0xf9   :  { %v3220_v46 = vmov 0.0   ;;  %v3129_v47 = vld [vmem:[%s4113_s2 + $0x290] ss:$20 sps:$4 sm:$0xff]  }
 0x115   :  { %v716_v48 = vpop.f32.mrb[4].mxu0  ;;  %v757_v49 = vpop.f32.mrb[4].mxu1 }
 0x116   :  { %v847_v50 = vmax.f32 %v636_v41, %v716_v48  ;;  %v718_v51 = vpop.f32.mrb[5].mxu0  ;;  %v759_v52 = vpop.f32.mrb[5].mxu1  ;;  %v3124_v41 = vld [vmem:[%s4113_s2 + $0x3a0] ss:$20 sps:$4 sm:$0xff]   ;;  %v3130_v48 = vld [vmem:[%s4113_s2 + $0x178] ss:$20 sps:$4 sm:$0xff]  }
 0x117   :  { %v848_v53 = vmax.f32 %v675_v36, %v718_v51  ;;  %v720_v54 = vpop.f32.mrb[6].mxu0  ;;  %v761_v55 = vpop.f32.mrb[6].mxu1  ;;  %v3121_v36 = vld [vmem:[%s4113_s2 + $0x398] ss:$20 sps:$4 sm:$0xff]   ;;  %v3133_v51 = vld [vmem:[%s4113_s2 + $0x1a0] ss:$20 sps:$4 sm:$0xff]  }
 0x118   :  { %v721_v56 = vpop.f32.mrb[7].mxu0  ;;  %v762_v57 = vpop.f32.mrb[7].mxu1  ;;  %v3136_v54 = vld [vmem:[%s4113_s2 + $0x1c8] ss:$20 sps:$4 sm:$0xff]  }
 0x119   :  { %v3137_v55 = vld [vmem:[%s4113_s2 + $0x88] ss:$20 sps:$4 sm:$0xff]   ;;  %v3139_v57 = vld [vmem:[%s4113_s2 + $0x1f0] ss:$20 sps:$4 sm:$0xff]  }
 0x11a   :  { %v3138_v56 = vld [vmem:[%s4113_s2 + $0x308] ss:$20 sps:$4 sm:$0xff]  }
 0x135   :  { %v798_v58 = vpop.f32.mrb[8].mxu0  ;;  %v839_v59 = vpop.f32.mrb[8].mxu1 }
 0x136   :  { %v850_v60 = vmax.f32 %v759_v52, %v839_v59  ;;  %v800_v61 = vpop.f32.mrb[9].mxu0  ;;  %v841_v62 = vpop.f32.mrb[9].mxu1  ;;  %v3134_v52 = vld [vmem:[%s4113_s2 + $0x60] ss:$20 sps:$4 sm:$0xff]   ;;  %v3141_v59 = vld [vmem:[%s4113_s2 + $0x330] ss:$20 sps:$4 sm:$0xff]  }
 0x137   :  { %v849_v63 = vmax.f32 %v757_v49, %v800_v61  ;;  %v851_v0 = vmax.f32 %v798_v58, %v841_v62  ;;  %v802_v1 = vpop.f32.mrb[10].mxu0  ;;  %v843_v3 = vpop.f32.mrb[10].mxu1  ;;  %v3131_v49 = vld [vmem:[%s4113_s2 + $0x38] ss:$20 sps:$4 sm:$0xff]   ;;  %v3140_v58 = vld [vmem:[%s4113_s2 + $0xb0] ss:$20 sps:$4 sm:$0xff]  }
 0x138   :  { %v853_v4 = vmax.f32 %v847_v50, %v850_v60  ;;  %v803_v5 = vpop.f32.mrb[11].mxu0  ;;  %v844_v6 = vpop.f32.mrb[11].mxu1  ;;  %v3132_v50 = vld [vmem:[%s4113_s2 + $0x2b8] ss:$20 sps:$4 sm:$0xff]   ;;  %v3147_v1 = vld [vmem:[%s4113_s2 + $0x380] ss:$20 sps:$4 sm:$0xff]  }
 0x139   :  { %v852_v7 = vmax.f32 %v846_v43, %v849_v63  ;;  %v3756_v8 = vmax.f32 %v848_v53, %v851_v0  ;;  %v3127_v43 = vld [vmem:[%s4113_s2 + $0x150] ss:$20 sps:$4 sm:$0xff]   ;;  %v3135_v53 = vld [vmem:[%s4113_s2 + $0x2e0] ss:$20 sps:$4 sm:$0xff]   ;;  %v3142_v60 = vld [vmem:[%s4113_s2 + $0x218] ss:$20 sps:$4 sm:$0xff]  }
 0x13a   :  { %v856_v9 = vmax.f32 %v853_v4, 0.0  ;;  %v3143_v61 = vld [vmem:[%s4113_s2 + $0xd8] ss:$20 sps:$4 sm:$0xff]   ;;  %v3145_v63 = vld [vmem:[%s4113_s2 + $0x240] ss:$20 sps:$4 sm:$0xff]  }
 0x13b   :  { %v855_v10 = vmax.f32 %v852_v7, 0.0  ;;  %v857_v42 = vmax.f32 %v3756_v8, 0.0  ;;  %v3144_v62 = vld [vmem:[%s4113_s2 + $0x358] ss:$20 sps:$4 sm:$0xff]   ;;  %v3146_v0 = vld [vmem:[%s4113_s2 + $0x100] ss:$20 sps:$4 sm:$0xff]  }
 0x13c   :  { %v3758_v11 = vpack.c.bf16 %v856_v9, %v856_v9  ;;  %v3148_v3 = vld [vmem:[%s4113_s2 + $0x268] ss:$20 sps:$4 sm:$0xff]   ;;  %v3151_v6 = vld [vmem:[%s4114_s3 + $0x40] sm:$0xff]  }
 0x13d   :  { %v3766_v14 = vpack.c.bf16 %v855_v10, %v855_v10  ;;  %v3865_v45 = vpack.c.bf16 %v857_v42, %v857_v42  ;;  %v3149_v4 = vld [vmem:[%s4113_s2 + $0x128] ss:$20 sps:$4 sm:$0xff]   ;;  %v3152_v7 = vld [vmem:[%s4114_s3 + $0xc0] sm:$0xff]  }
 0x13e   :  { %1661 = vmatprep.mubr.bf16.mxu0 %v3758_v11  ;;  %1743 = vmatprep.mubr.bf16.mxu1 %v3758_v11  ;;  %v3150_v5 = vld [vmem:[%s4113_s2 + $0x3a8] ss:$20 sps:$4 sm:$0xff]   ;;  %v3153_v8 = vld [vmem:[%s4114_s3] sm:$0xff]  }
 0x13f   :  { %1662 = vmatmul.mubr.bf16.vlgmr.msra.gmra.mrb[12].mxu0 %v3766_v14  ;;  %1744 = vmatmul.mubr.bf16.vlgmr.msra.gmra.mrb[12].mxu1 %v3766_v14  ;;  %v3154_v9 = vld [vmem:[%s4114_s3 + $0x80] sm:$0xff]   ;;  %v3155_v10 = vld [vmem:[%s4114_s3 + $0x48] sm:$0xff]  }
 0x140   :  { %1671 = vmatpush1.bf16.msra.mxu0 %v3079_v12  ;;  %1753 = vmatpush1.bf16.msra.mxu1 %v3082_v13  ;;  %v3157_v12 = vld [vmem:[%s4114_s3 + $0x8] sm:$0xff]  }
 0x141   :  { %1672 = vmatprep.subr.bf16.mxu0 %v3087_v15  ;;  %1754 = vmatprep.subr.bf16.mxu1 %v3090_v16  ;;  %v3158_v13 = vld [vmem:[%s4114_s3 + $0x88] sm:$0xff]   ;;  %v3159_v15 = vld [vmem:[%s4114_s3 + $0x50] sm:$0xff]  }
 0x142   :  { %1702 = vmatprep.mubr.bf16.mxu0 %v3219_v2  ;;  %1784 = vmatprep.mubr.bf16.mxu1 %v3219_v2  ;;  %v3102_v2 = vld [vmem:[%s4113_s2 + $0x304] ss:$20 sps:$4 sm:$0xff]   ;;  %v3161_v16 = vld [vmem:[%s4114_s3 + $0x10] sm:$0xff]  }
 0x144   :  { %1673 = vmatpush1.bf16.msra.mxu0 %v3085_v17  ;;  %1755 = vmatpush1.bf16.msra.mxu1 %v3088_v18  ;;  %v3162_v17 = vld [vmem:[%s4114_s3 + $0x90] sm:$0xff]   ;;  %v3163_v18 = vld [vmem:[%s4114_s3 + $0x58] sm:$0xff]  }
 0x145   :  { %1674 = vmatprep.subr.bf16.mxu0 %v3093_v19  ;;  %1756 = vmatprep.subr.bf16.mxu1 %v3096_v20  ;;  %v3164_v19 = vld [vmem:[%s4114_s3 + $0xd8] sm:$0xff]  }
 0x146   :  { %v3165_v20 = vld [vmem:[%s4114_s3 + $0x18] sm:$0xff]  }
 0x148   :  { %1675 = vmatpush1.bf16.msra.mxu0 %v3091_v21  ;;  %1757 = vmatpush1.bf16.msra.mxu1 %v3094_v22  ;;  %v3166_v21 = vld [vmem:[%s4114_s3 + $0x98] sm:$0xff]   ;;  %v3167_v22 = vld [vmem:[%s4114_s3 + $0x60] sm:$0xff]  }
 0x149   :  { %1676 = vmatprep.subr.bf16.mxu0 %v3099_v23  ;;  %1758 = vmatprep.subr.bf16.mxu1 %v3102_v2  ;;  %v3168_v23 = vld [vmem:[%s4114_s3 + $0xe0] sm:$0xff]  }
 0x14a   :  { %v3169_v2 = vld [vmem:[%s4114_s3 + $0x20] sm:$0xff]  }
 0x14c   :  { %1677 = vmatpush1.bf16.msra.mxu0 %v3097_v24  ;;  %1759 = vmatpush1.bf16.msra.mxu1 %v3100_v25  ;;  %v3170_v24 = vld [vmem:[%s4114_s3 + $0xa0] sm:$0xff]   ;;  %v3171_v25 = vld [vmem:[%s4114_s3 + $0x68] sm:$0xff]  }
 0x14d   :  { %1678 = vmatprep.subr.bf16.mxu0 %v3105_v26  ;;  %1760 = vmatprep.subr.bf16.mxu1 %v3108_v27  ;;  %v3172_v26 = vld [vmem:[%s4114_s3 + $0xe8] sm:$0xff]  }
 0x14e   :  { %v3173_v27 = vld [vmem:[%s4114_s3 + $0x28] sm:$0xff]  }
 0x150   :  { %1679 = vmatpush1.bf16.msra.mxu0 %v3103_v28  ;;  %1761 = vmatpush1.bf16.msra.mxu1 %v3106_v29  ;;  %v3174_v28 = vld [vmem:[%s4114_s3 + $0xa8] sm:$0xff]   ;;  %v3175_v29 = vld [vmem:[%s4114_s3 + $0x70] sm:$0xff]  }
 0x151   :  { %1680 = vmatprep.subr.bf16.mxu0 %v3111_v30  ;;  %1762 = vmatprep.subr.bf16.mxu1 %v3114_v31  ;;  %v3176_v30 = vld [vmem:[%s4114_s3 + $0xf0] sm:$0xff]  }
 0x152   :  { %v3177_v31 = vld [vmem:[%s4114_s3 + $0x30] sm:$0xff]  }
 0x154   :  { %1681 = vmatpush1.bf16.msra.mxu0 %v3109_v32  ;;  %1763 = vmatpush1.bf16.msra.mxu1 %v3112_v33  ;;  %v3178_v32 = vld [vmem:[%s4114_s3 + $0xb0] sm:$0xff]   ;;  %v3179_v33 = vld [vmem:[%s4114_s3 + $0x78] sm:$0xff]  }
 0x155   :  { %1682 = vmatprep.subr.bf16.mxu0 %v3117_v34  ;;  %1764 = vmatprep.subr.bf16.mxu1 %v3120_v35  ;;  %v3180_v34 = vld [vmem:[%s4114_s3 + $0xf8] sm:$0xff]  }
 0x156   :  { %v3181_v35 = vld [vmem:[%s4114_s3 + $0x38] sm:$0xff]  }
 0x158   :  { %1683 = vmatpush1.bf16.msra.mxu0 %v3115_v37  ;;  %1765 = vmatpush1.bf16.msra.mxu1 %v3118_v38  ;;  %v3182_v37 = vld [vmem:[%s4114_s3 + $0xb8] sm:$0xff]  }
 0x159   :  { %1684 = vmatprep.subr.bf16.mxu0 %v3123_v39  ;;  %1766 = vmatprep.subr.bf16.mxu1 %v3126_v40 }
 0x15c   :  { %1685 = vmatpush1.bf16.msra.mxu0 %v3121_v36  ;;  %1767 = vmatpush1.bf16.msra.mxu1 %v3124_v41 }
 0x15d   :  { %2686 = vmatprep.subr.bf16.mxu0 %v3127_v43  ;;  %2775 = vmatprep.subr.bf16.mxu1 %v3220_v46 }
 0x15f   :  { %1703 = vmatmul.mubr.bf16.vlgmr.msra.gmra.mrb[12].mxu0 %v3865_v45  ;;  %1785 = vmatmul.mubr.bf16.vlgmr.msra.gmra.mrb[12].mxu1 %v3865_v45 }
 0x160   :  { %2687 = vmatpush3.bf16.msra.mxu0 %v3128_v44  ;;  %1825 = vmatprep.mubr.bf16.mxu0 %v3758_v11  ;;  %v3156_v11 = vld [vmem:[%s4114_s3 + $0xc8] sm:$0xff]  }
 0x161   :  { %2776 = vmatpush3.bf16.msra.mxu1 %v3129_v47  ;;  %2688 = vmatprep.subr.bf16.mxu0 %v3130_v48 }
 0x162   :  { %2777 = vmatprep.subr.bf16.mxu1 %v3220_v46  ;;  %2791 = vmatprep.mubr.msk.bf16.mxu1 %vm3221_vm0, %v3220_v46 }
 0x164   :  { %2689 = vmatpush3.bf16.msra.mxu0 %v3131_v49 }
 0x165   :  { %2778 = vmatpush3.bf16.msra.mxu1 %v3132_v50  ;;  %2690 = vmatprep.subr.bf16.mxu0 %v3133_v51 }
 0x166   :  { %2779 = vmatprep.subr.bf16.mxu1 %v3220_v46 }
 0x168   :  { %2691 = vmatpush3.bf16.msra.mxu0 %v3134_v52  ;;  %v3183_v52 = vld [vmem:[%s4114_s3 + $0x100] sm:$0xff]  }
 0x169   :  { %2780 = vmatpush3.bf16.msra.mxu1 %v3135_v53  ;;  %2692 = vmatprep.subr.bf16.mxu0 %v3136_v54 }
 0x16a   :  { %2781 = vmatprep.subr.bf16.mxu1 %v3220_v46 }
 0x16c   :  { %2693 = vmatpush3.bf16.msra.mxu0 %v3137_v55  ;;  %v3184_v55 = vld [vmem:[%s4114_s3 + $0x108] sm:$0xff]  }
 0x16d   :  { %2782 = vmatpush3.bf16.msra.mxu1 %v3138_v56  ;;  %2694 = vmatprep.subr.bf16.mxu0 %v3139_v57  ;;  %v3185_v56 = vld [vmem:[%s4114_s3 + $0x110] sm:$0xff]   ;;  %v3186_v57 = vld [vmem:[%s4114_s3 + $0x118] sm:$0xff]  }
 0x16e   :  { %2783 = vmatprep.subr.bf16.mxu1 %v3220_v46 }
 0x170   :  { %2695 = vmatpush3.bf16.msra.mxu0 %v3140_v58 }
 0x171   :  { %2784 = vmatpush3.bf16.msra.mxu1 %v3141_v59  ;;  %2696 = vmatprep.subr.bf16.mxu0 %v3142_v60 }
 0x172   :  { %2785 = vmatprep.subr.bf16.mxu1 %v3220_v46 }
 0x174   :  { %2697 = vmatpush3.bf16.msra.mxu0 %v3143_v61 }
 0x175   :  { %2786 = vmatpush3.bf16.msra.mxu1 %v3144_v62  ;;  %2698 = vmatprep.subr.bf16.mxu0 %v3145_v63 }
 0x176   :  { %2787 = vmatprep.subr.bf16.mxu1 %v3220_v46 }
 0x178   :  { %2699 = vmatpush3.bf16.msra.mxu0 %v3146_v0 }
 0x179   :  { %2788 = vmatpush3.bf16.msra.mxu1 %v3147_v1  ;;  %2700 = vmatprep.subr.bf16.mxu0 %v3148_v3 }
 0x17a   :  { %2789 = vmatprep.subr.bf16.mxu1 %v3220_v46 }
 0x17c   :  { %2701 = vmatpush3.bf16.msra.mxu0 %v3149_v4 }
 0x17d   :  { %2790 = vmatpush3.bf16.msra.mxu1 %v3150_v5  ;;  %2717 = vmatprep.subr.bf16.mxu0 %v3151_v6 }
 0x17e   :  { %2739 = vmatprep.subr.bf16.mxu1 %v3152_v7  ;;  %v3187_v7 = vld [vmem:[%s4114_s3 + $0x120] sm:$0xff]  }
 0x17f   :  { %1826 = vmatmul.mubr.bf16.vlgmr.msra.gmra.mrb[16].mxu0 %v3766_v14  ;;  %v3160_v14 = vld [vmem:[%s4114_s3 + $0xd0] sm:$0xff]  }
 0x180   :  { %2792 = vmatmul.mubr.bf16.vlgmr.msra.gmra.mrb[16].mxu1 %v3865_v45  ;;  %2718 = vmatpush3.bf16.msra.mxu0 %v3153_v8  ;;  %v3188_v8 = vld [vmem:[%s4114_s3 + $0x128] sm:$0xff]  }
 0x181   :  { %2740 = vmatpush3.bf16.msra.mxu1 %v3154_v9  ;;  %2719 = vmatprep.subr.bf16.mxu0 %v3155_v10  ;;  %v3189_v9 = vld [vmem:[%s4114_s3 + $0x130] sm:$0xff]   ;;  %v3190_v10 = vld [vmem:[%s4114_s3 + $0x138] sm:$0xff]  }
 0x182   :  { %2741 = vmatprep.subr.bf16.mxu1 %v3156_v11  ;;  %v3191_v11 = vld [vmem:[%s4114_s3 + $0x140] sm:$0xff]  }
 0x184   :  { %2720 = vmatpush3.bf16.msra.mxu0 %v3157_v12  ;;  %v3192_v12 = vld [vmem:[%s4114_s3 + $0x148] sm:$0xff]  }
 0x185   :  { %2742 = vmatpush3.bf16.msra.mxu1 %v3158_v13  ;;  %2721 = vmatprep.subr.bf16.mxu0 %v3159_v15  ;;  %v3193_v13 = vld [vmem:[%s4114_s3 + $0x150] sm:$0xff]   ;;  %v1972_v15 = vlaneseq }
 0x186   :  { %2743 = vmatprep.subr.bf16.mxu1 %v3160_v14  ;;  %v3194_v14 = vld [vmem:[%s4114_s3 + $0x158] sm:$0xff]   ;;  %s3222_s3 = smov [#allocation2]  }
 0x188   :  { %2722 = vmatpush3.bf16.msra.mxu0 %v3161_v16  ;;  %v1973_v16 = vshrl.u32 %v1972_v15, 7 }
 0x189   :  { %2744 = vmatpush3.bf16.msra.mxu1 %v3162_v17  ;;  %2723 = vmatprep.subr.bf16.mxu0 %v3163_v18  ;;  %v1966_v18 = vld [vmem:[%s4115_s4] sm:$0x3]  ;;  %s2417_s4 = sshll.u32 %s3222_s3, 4  ;;  %s2418_s4 = int_to_ptr.vmem [resolvable:$true] %s2417_s4 }
 0x18a   :  { %2745 = vmatprep.subr.bf16.mxu1 %v3164_v19  ;;  %v2320_v17 = vsub.s32 1, %v1973_v16  ;;  %s3195_s10 = scalar_lea.vmem %s2418_s4, 32  ;;  %p3200_p1 = scmp.lt.s32.totalorder %s2418_s4, %s2418_s4 }
 0x18b   :  { %p3196_p0 = scmp.ne.s32.totalorder %s2418_s4, %s3195_s10  ;;  %p3201_p2 = scmp.lt.s32.totalorder %s3195_s10, %s3195_s10 }
 0x18c   :  { %2724 = vmatpush3.bf16.msra.mxu0 %v3165_v20  ;;  %v2321_v19 = vrot.slane %v1966_v18, %v2320_v17  ;;  %v1974_v20 = vsub.s32 0, %v1973_v16 }
 0x18d   :  { %2746 = vmatpush3.bf16.msra.mxu1 %v3166_v21  ;;  %2725 = vmatprep.subr.bf16.mxu0 %v3167_v22  ;;  %p3202_p3 = por %p3201_p2, %p3200_p1 }
 0x18e   :  { %2747 = vmatprep.subr.bf16.mxu1 %v3168_v23  ;;  %v1975_v23 = vrot.slane %v1966_v18, %v1974_v20 }
 0x18f   :  { %p3203_p4 = pnand %p3202_p3, %p3196_p0 }
 0x190   :  { %2726 = vmatpush3.bf16.msra.mxu0 %v3169_v2 }
 0x191   :  { %2748 = vmatpush3.bf16.msra.mxu1 %v3170_v24  ;;  %2727 = vmatprep.subr.bf16.mxu0 %v3171_v25 }
 0x192   :  { %2749 = vmatprep.subr.bf16.mxu1 %v3172_v26 }
 0x194   :  { %2728 = vmatpush3.bf16.msra.mxu0 %v3173_v27 }
 0x195   :  { %2750 = vmatpush3.bf16.msra.mxu1 %v3174_v28  ;;  %2729 = vmatprep.subr.bf16.mxu0 %v3175_v29 }
 0x196   :  { %2751 = vmatprep.subr.bf16.mxu1 %v3176_v30 }
 0x198   :  { %2730 = vmatpush3.bf16.msra.mxu0 %v3177_v31 }
 0x199   :  { %2752 = vmatpush3.bf16.msra.mxu1 %v3178_v32  ;;  %2731 = vmatprep.subr.bf16.mxu0 %v3179_v33 }
 0x19a   :  { %2753 = vmatprep.subr.bf16.mxu1 %v3180_v34 }
 0x19c   :  { %2732 = vmatpush3.bf16.msra.mxu0 %v3181_v35 }
 0x19d   :  { %2754 = vmatpush3.bf16.msra.mxu1 %v3182_v37  ;;  %2795 = vmatprep.subr.bf16.mxu0 %v3220_v46 }
 0x19e   :  { %2807 = vmatprep.subr.bf16.mxu1 %v3220_v46 }
 0x232   :  { %v1704_v38 = vpop.f32.mrb[12].mxu0  ;;  %v1786_v39 = vpop.f32.mrb[12].mxu1 }
 0x233   :  { %v1873_v40 = vmax.f32 %v1704_v38, 0.0  ;;  %v1875_v36 = vmax.f32 %v1786_v39, 0.0  ;;  %v1706_v41 = vpop.f32.mrb[13].mxu0  ;;  %v1788_v42 = vpop.f32.mrb[13].mxu1 }
 0x234   :  { %v1874_v43 = vmax.f32 %v1706_v41, 0.0  ;;  %v1876_v44 = vmax.f32 %v1788_v42, 0.0  ;;  %v1708_v45 = vpop.f32.mrb[14].mxu0  ;;  %v1790_v47 = vpop.f32.mrb[14].mxu1 }
 0x235   :  { %v1709_v48 = vpop.f32.mrb[15].mxu0  ;;  %v1791_v49 = vpop.f32.mrb[15].mxu1  ;;  %v1967_v53 = vpack.c.bf16 %v1873_v40, %v1873_v40  ;;  %v1969_v54 = vpack.c.bf16 %v1875_v36, %v1875_v36 }
 0x236   :  { %v1968_v50 = vpack.c.bf16 %v1874_v43, %v1874_v43  ;;  %v1970_v51 = vpack.c.bf16 %v1876_v44, %v1876_v44 }
 0x238   :  { %2228 = vmatprep.mubr.bf16.mxu0 %v1968_v50  ;;  %2268 = vmatprep.mubr.bf16.mxu1 %v1970_v51 }
 0x239   :  { %2229 = vmatmul.mubr.bf16.vlgmr.msra.gmra.mrb[20].mxu0 %v1967_v53  ;;  %2269 = vmatmul.mubr.bf16.vlgmr.msra.gmra.mrb[20].mxu1 %v1969_v54 }
 0x23a   :  { %2796 = vmatpush3.bf16.msra.mxu0 %v3183_v52  ;;  %2803 = vmatprep.mubr.msk.bf16.mxu0 %vm3221_vm0, %v3220_v46 }
 0x23b   :  { %2797 = vmatprep.subr.bf16.mxu0 %v3220_v46  ;;  %2823 = vmatprep.mubr.msk.bf16.mxu1 %vm3221_vm0, %v3220_v46 }
 0x23c   :  { %2808 = vmatpush3.bf16.msra.mxu1 %v3187_v7 }
 0x23d   :  { %2809 = vmatprep.subr.bf16.mxu1 %v3220_v46 }
 0x23e   :  { %2798 = vmatpush3.bf16.msra.mxu0 %v3184_v55 }
 0x23f   :  { %2799 = vmatprep.subr.bf16.mxu0 %v3220_v46 }
 0x240   :  { %2810 = vmatpush3.bf16.msra.mxu1 %v3188_v8 }
 0x241   :  { %2811 = vmatprep.subr.bf16.mxu1 %v3220_v46 }
 0x242   :  { %2800 = vmatpush3.bf16.msra.mxu0 %v3185_v56 }
 0x243   :  { %2801 = vmatprep.subr.bf16.mxu0 %v3220_v46 }
 0x244   :  { %2812 = vmatpush3.bf16.msra.mxu1 %v3189_v9 }
 0x245   :  { %2813 = vmatprep.subr.bf16.mxu1 %v3220_v46 }
 0x246   :  { %2802 = vmatpush3.bf16.msra.mxu0 %v3186_v57 }
 0x248   :  { %2814 = vmatpush3.bf16.msra.mxu1 %v3190_v10 }
 0x249   :  { %2815 = vmatprep.subr.bf16.mxu1 %v3220_v46 }
 0x24c   :  { %2816 = vmatpush3.bf16.msra.mxu1 %v3191_v11 }
 0x24d   :  { %2817 = vmatprep.subr.bf16.mxu1 %v3220_v46 }
 0x250   :  { %2818 = vmatpush3.bf16.msra.mxu1 %v3192_v12 }
 0x251   :  { %2819 = vmatprep.subr.bf16.mxu1 %v3220_v46 }
 0x252   :  { %v2702_v58 = vpop.f32.mrb[16].mxu0 }
 0x253   :  { %v1867_v59 = vpop.f32.mrb[16].mxu1  ;;  %v2703_v60 = vpop.f32.mrb[17].mxu0 }
 0x254   :  { %v2704_v61 = vadd.f32 %v2703_v60, %v2702_v58  ;;  %v2793_v62 = vpop.f32.mrb[17].mxu1  ;;  %v2705_v63 = vpop.f32.mrb[18].mxu0  ;;  %2820 = vmatpush3.bf16.msra.mxu1 %v3193_v13 }
 0x255   :  { %v1870_v0 = vpop.f32.mrb[18].mxu1  ;;  %v2706_v1 = vpop.f32.mrb[19].mxu0  ;;  %2821 = vmatprep.subr.bf16.mxu1 %v3220_v46 }
 0x256   :  { %v1868_v3 = vadd.f32 %v2704_v61, %v1867_v59  ;;  %v2794_v4 = vpop.f32.mrb[19].mxu1 }
 0x258   :  { %v1877_v5 = vmax.f32 %v1868_v3, 0.0  ;;  %2822 = vmatpush3.bf16.msra.mxu1 %v3194_v14 }
 0x25a   :  { %v1971_v6 = vpack.c.bf16 %v1877_v5, %v1877_v5 }
 0x25c   :  { %2804 = vmatmul.mubr.msk.bf16.vlgmr.msra.gmra.mrb[24].mxu0 %vm2192_vm1, %v1971_v6 }
 0x30c   :  { %v2733_v21 = vpop.f32.mrb[20].mxu0  ;;  %v2755_v22 = vpop.f32.mrb[20].mxu1 }
 0x30d   :  { %v2734_v2 = vpop.f32.mrb[21].mxu0  ;;  %v2756_v24 = vpop.f32.mrb[21].mxu1 }
 0x30e   :  { %v2735_v25 = vadd.f32 %v2734_v2, %v2733_v21  ;;  %v2757_v46 = vadd.f32 %v2756_v24, %v2755_v22  ;;  %v2736_v26 = vpop.f32.mrb[22].mxu0  ;;  %v2758_v27 = vpop.f32.mrb[22].mxu1 }
 0x30f   :  { %v2737_v28 = vpop.f32.mrb[23].mxu0  ;;  %v2759_v29 = vpop.f32.mrb[23].mxu1 }
 0x310   :  { %v2231_v30 = vadd.f32 %v2735_v25, %v1975_v23 }
 0x312   :  { %v2271_v31 = vadd.f32 %v2757_v46, %v2231_v30 }
 0x32f   :  { %v2310_v32 = vpop.f32.mrb[24].mxu0 }
 0x330   :  { %v2311_v33 = vadd.f32 %v2310_v32, %v2271_v31  ;;  %v2805_v34 = vpop.f32.mrb[25].mxu0 }
 0x331   :  { %v2313_v35 = vpop.f32.mrb[26].mxu0 }
 0x332   :  { %v2316_v37 = vmax.f32 %v2311_v33, 0.0  ;;  %v2806_v38 = vpop.f32.mrb[27].mxu0 }
 0x334   :  { %v2317_v39 = vpack.c.bf16 %v2316_v37, %v2316_v37 }
 0x336   :  { %2824 = vmatmul.mubr.bf16.vlgmr.msra.gmra.mrb[24].mxu1 %v2317_v39 }
 0x409   :  { %v2404_v40 = vpop.f32.mrb[24].mxu1 }
 0x40a   :  { %v2405_v36 = vadd.f32 %v2404_v40, %v2321_v19  ;;  %v2825_v41 = vpop.f32.mrb[25].mxu1 }
 0x40b   :  { %v2407_v42 = vpop.f32.mrb[26].mxu1 }
 0x40c   :  { %2410 = vst [vmem:[#allocation2] sm:$0x3] %v2405_v36  ;;  %v2826_v43 = vpop.f32.mrb[27].mxu1 }
 0x40d   :  { %3206 = shalt.err (!%p3203_p4)
}
 0x40e   :  { %s3207_s1 = scalar_lea.hbm %s4116_s5, 32 }
 0x40f   :  { %p3208_p5 = scmp.ne.s32.totalorder %s4116_s5, %s3207_s1  ;;  %p3211_p6 = scmp.lt.u32.totalorder %s3207_s1, %s4116_s5 }
 0x411   :  { %p3213_p7 = pnand %p3211_p6, %p3208_p5 }
 0x413   :  { %3216 = shalt.err (!%p3213_p7)
}
 0x414   :  { %2420 = dma.vmem_to_hbm [thread:$0]  %s2418_s4, 32, %s4116_s5, [#allocation3]  }
 0x415   :  { %3217 = dma.done.wait [#allocation3], 32  }
 0x416   :  { %3218 = vsyncadd [#allocation3], 4294967264 }
 0x417   :  { %2424 = vsyncpa [#allocation3], 1 }

</bundles_post_ra>
